<compile_context>
chip_gen: v7x
topology: tpu7x:2x2x1
jax: 0.10.0
libtpu: 0.0.40
codegen_flags: <defaults>
</compile_context>

<pallas_src>
import functools

import jax
import jax.numpy as jnp
from jax import lax
from jax.experimental import pallas as pl
from jax.experimental.pallas import tpu as pltpu


def _sigmoid(x):
    # exp -> EUP; reciprocal kept exact (approx=False) so it matches the ref.
    return pl.reciprocal(1.0 + jnp.exp(-x))


# ------------------------------ fused kernel ----------------------------------

def _asym_fusion_kernel(H, W,
                        xh_ref, xl_ref,
                        w_plus_ref, b_plus_ref,
                        w_pa1_ref, b_pa1_ref, w_pa2_ref, b_pa2_ref,
                        w_ca1_ref, b_ca1_ref, w_ca2_ref, b_ca2_ref,
                        w_end_ref, b_end_ref,
                        out_ref):
    f32 = jnp.float32
    bf16 = jnp.bfloat16
    HW = H * W

    xh = xh_ref[...]                                     # (Ch, HW) bf16
    xl = xl_ref[...]                                     # (Cl, HW) bf16

    # ---- plus_conv: 1x1 conv (+ folded BN) + ReLU -----------------------------
    xh2 = jnp.dot(w_plus_ref[...], xh, preferred_element_type=f32)
    xh2 = jnp.maximum(xh2 + b_plus_ref[...], 0.0)        # (Cl, HW) f32

    # ---- pa branch (pixel attention) on x_low ---------------------------------
    h1 = jnp.dot(w_pa1_ref[...], xl, preferred_element_type=f32)
    h1 = jnp.maximum(h1 + b_pa1_ref[...], 0.0)           # (Cl//4, HW) f32
    pa = jnp.dot(w_pa2_ref[...], h1.astype(bf16), preferred_element_type=f32)
    pa = _sigmoid(pa + b_pa2_ref[...])                   # (Cl, HW) f32

    # ---- ca branch (channel attention): GAP over pixels -----------------------
    gap = jnp.mean(xh2, axis=1, keepdims=True)           # (Cl, 1) f32
    gapb = jnp.broadcast_to(gap, (gap.shape[0], 128)).astype(bf16)
    c1 = jnp.dot(w_ca1_ref[...], gapb, preferred_element_type=f32)
    c1 = jnp.maximum(c1 + b_ca1_ref[...], 0.0)           # (Cl//4, 128) f32
    ca = jnp.dot(w_ca2_ref[...], c1.astype(bf16), preferred_element_type=f32)
    ca = _sigmoid(ca + b_ca2_ref[...])                   # (Cl, 128), identical cols
    ca = ca[:, 0:1]                                      # (Cl, 1)

    # ---- feat = x_low + plus_conv(x_high) -------------------------------------
    feat = xl.astype(f32) + xh2                          # (Cl, HW) f32

    # ---- end_conv: 3x3 conv as ONE stacked matmul over 9 shifted copies -------
    # border-validity masks, built once (VPU); lane roll is XLU (free slot).
    pos = lax.broadcasted_iota(jnp.int32, (1, HW), 1)
    if (W & (W - 1)) == 0:
        col = jnp.bitwise_and(pos, W - 1)                # x coordinate of each lane
    else:
        col = pos % W  # TODO(synk): non-power-of-two W falls back to vector mod.
    top_ok = pos >= W                                    # dy = -1: input row >= 0
    bot_ok = pos < (H - 1) * W                           # dy = +1: input row <= H-1
    left_ok = col >= 1                                   # dx = -1: input col >= 0
    right_ok = col < W - 1                               # dx = +1: input col <= W-1

    taps = []
    for dy in (-1, 0, 1):
        for dx in (-1, 0, 1):
            off = dy * W + dx
            if off == 0:
                taps.append(feat)
                continue
            # want shifted[p] = feat[p + off]  (jnp.roll semantics)
            rolled = pltpu.roll(feat, shift=(-off) % HW, axis=1)
            conds = []
            if dy < 0:
                conds.append(top_ok)
            if dy > 0:
                conds.append(bot_ok)
            if dx < 0:
                conds.append(left_ok)
            if dx > 0:
                conds.append(right_ok)
            valid = conds[0]
            for c in conds[1:]:
                valid = valid & c
            taps.append(jnp.where(valid, rolled, 0.0))

    stacked = jnp.concatenate(taps, axis=0).astype(bf16)  # (9*Cl, HW) bf16
    acc = jnp.dot(w_end_ref[...], stacked, preferred_element_type=f32)  # (Co, HW)

    y = jnp.maximum(acc + b_end_ref[...], 0.0)            # (Co, HW) f32
    out_ref[...] = y * ca * pa


# --------------------------------- wrapper -------------------------------------

def asym_fusion_forward(x_high, x_low, params):
    """x_high: (B, Ch, H, W), x_low: (B, Cl, H, W) (bf16 or f32), NCHW."""
    B, Ch, H, W = x_high.shape
    Cl = x_low.shape[1]
    Co = params['w_end'].shape[0]          # w_end is (Co, 9*Cl) flat tap layout
    HW = H * W
    assert Co == Cl, "module requires planes_out == planes_low for ca/pa broadcast"

    xh = x_high.reshape(B, Ch, HW)    # NCHW is already (B, C, H*W): no transpose
    xl = x_low.reshape(B, Cl, HW)

    def batched(c):
        return pl.BlockSpec((None, c, HW), lambda b: (b, 0, 0))

    def full(a):
        nd = a.ndim
        return pl.BlockSpec(a.shape, lambda b, _nd=nd: (0,) * _nd)

    w_args = (params['w_plus'], params['b_plus'],
              params['w_pa1'], params['b_pa1'],
              params['w_pa2'], params['b_pa2'],
              params['w_ca1'], params['b_ca1'],
              params['w_ca2'], params['b_ca2'],
              params['w_end'], params['b_end'])

    out = pl.pallas_call(
        functools.partial(_asym_fusion_kernel, H, W),
        grid=(B,),
        in_specs=[batched(Ch), batched(Cl)] + [full(a) for a in w_args],
        out_specs=pl.BlockSpec((None, Co, HW), lambda b: (b, 0, 0)),
        out_shape=jax.ShapeDtypeStruct((B, Co, HW), jnp.float32),
        compiler_params=pltpu.CompilerParams(
            dimension_semantics=("parallel",)),
    )(xh, xl, *w_args)

    return out.reshape(B, Co, H, W)   # already NCHW


# ------------------------- parameter init (+ BN fold) --------------------------

def _fold_conv_bn(w, b, gamma, beta, mean, var, eps=1e-5):
    # w: (Co, Ci, kh, kw) torch layout
    scale = gamma / jnp.sqrt(var + eps)
    w_f = w * scale[:, None, None, None]
    b_f = (b - mean) * scale + beta
    return w_f, b_f


def init_params(key, planes_high, planes_low, planes_out):
    Cl4 = planes_low // 4
    keys = jax.random.split(key, 48)
    it = iter(keys)

    def conv(ci, co, k):
        return (0.2 * jax.random.normal(next(it), (co, ci, k, k), jnp.float32),
                0.1 * jax.random.normal(next(it), (co,), jnp.float32))

    def bn(c):
        return (1.0 + 0.1 * jax.random.normal(next(it), (c,), jnp.float32),         # gamma
                0.1 * jax.random.normal(next(it), (c,), jnp.float32),                # beta
                0.1 * jax.random.normal(next(it), (c,), jnp.float32),                # mean
                1.0 + 0.1 * jnp.abs(jax.random.normal(next(it), (c,), jnp.float32)))  # var

    w, b = conv(planes_low, Cl4, 1);        wpa1, bpa1 = _fold_conv_bn(w, b, *bn(Cl4))
    w, b = conv(Cl4, planes_low, 1);        wpa2, bpa2 = _fold_conv_bn(w, b, *bn(planes_low))
    w, b = conv(planes_high, planes_low, 1); wplus, bplus = _fold_conv_bn(w, b, *bn(planes_low))
    w, b = conv(planes_low, Cl4, 1);        wca1, bca1 = _fold_conv_bn(w, b, *bn(Cl4))
    w, b = conv(Cl4, planes_low, 1);        wca2, bca2 = _fold_conv_bn(w, b, *bn(planes_low))
    w, b = conv(planes_low, planes_out, 3); wend, bend = _fold_conv_bn(w, b, *bn(planes_out))

    bf16 = jnp.bfloat16

    def mat1x1(w4):                          # (Co, Ci, 1, 1) -> (Co, Ci) bf16
        return w4[:, :, 0, 0].astype(bf16)

    # Flat tap-major layout for the single stacked end_conv matmul:
    # columns are blocked by tap t = 3*ky + kx, channel index inner.
    wend_bf = wend.astype(bf16)              # (Co, Ci, 3, 3)
    w_end_flat = jnp.concatenate(
        [wend_bf[:, :, ky, kx] for ky in range(3) for kx in range(3)], axis=1)

    col = lambda v: v.reshape(-1, 1).astype(jnp.float32)   # (C,) -> (C, 1)

    return dict(
        w_plus=mat1x1(wplus), b_plus=col(bplus),
        w_pa1=mat1x1(wpa1), b_pa1=col(bpa1),
        w_pa2=mat1x1(wpa2), b_pa2=col(bpa2),
        w_ca1=mat1x1(wca1), b_ca1=col(bca1),
        w_ca2=mat1x1(wca2), b_ca2=col(bca2),
        w_end=w_end_flat, b_end=col(bend),
    )


# ------------------------------ pure-JAX reference -----------------------------

def ref_forward(x_high, x_low, p):
    f32, bf16 = jnp.float32, jnp.bfloat16
    relu = lambda v: jnp.maximum(v, 0.0)
    sig = lambda v: 1.0 / (1.0 + jnp.exp(-v))
    up = lambda a: a.astype(f32)
    mm = functools.partial(jnp.einsum, precision=jax.lax.Precision.HIGHEST)

    B, Ch, H, W = x_high.shape
    Cl = x_low.shape[1]
    Co = p['w_end'].shape[0]
    HW = H * W

    xh = up(x_high).reshape(B, Ch, HW)
    xl = up(x_low).reshape(B, Cl, HW)

    xh2 = relu(mm('oc,bcp->bop', up(p['w_plus']), xh) + p['b_plus'])
    h1 = relu(mm('oc,bcp->bop', up(p['w_pa1']), xl) + p['b_pa1'])
    h1 = up(h1.astype(bf16))
    pa = sig(mm('oc,bcp->bop', up(p['w_pa2']), h1) + p['b_pa2'])

    gap = jnp.mean(xh2, axis=2, keepdims=True)
    gap = up(gap.astype(bf16))
    c1 = relu(mm('oc,bcp->bop', up(p['w_ca1']), gap) + p['b_ca1'])
    c1 = up(c1.astype(bf16))
    ca = sig(mm('oc,bcp->bop', up(p['w_ca2']), c1) + p['b_ca2'])

    feat = (xl + xh2).astype(bf16)
    featp = jnp.pad(feat.reshape(B, Cl, H, W), ((0, 0), (0, 0), (1, 1), (1, 1)))

    w_end_taps = p['w_end'].reshape(Co, 9, Cl)            # tap-major flat -> (Co,9,Cl)
    acc = jnp.zeros((B, Co, HW), f32)
    t = 0
    for ky in range(3):
        for kx in range(3):
            win = featp[:, :, ky:ky + H, kx:kx + W].reshape(B, Cl, HW)
            acc = acc + mm('oc,bcp->bop', up(w_end_taps[:, t, :]), up(win))
            t += 1
    y = relu(acc + p['b_end'])
    out = y * ca * pa
    return out.reshape(B, Co, H, W)


# ------------------------------------ main --------------------------------------

if __name__ == "__main__":
    key = jax.random.PRNGKey(0)
    B, H, W = 2, 16, 16
    # planes_out must equal planes_low for the feat*ca / feat*pa broadcasts,
    # exactly as implied by the PyTorch module's forward.
    planes_high, planes_low, planes_out = 8, 8, 8

    kd, kp = jax.random.split(key)
    k1, k2 = jax.random.split(kd)
    x_high = jax.random.normal(k1, (B, planes_high, H, W), jnp.float32).astype(jnp.bfloat16)
    x_low = jax.random.normal(k2, (B, planes_low, H, W), jnp.float32).astype(jnp.bfloat16)
    params = init_params(kp, planes_high, planes_low, planes_out)

    out = jax.block_until_ready(asym_fusion_forward(x_high, x_low, params))

    ref = jax.block_until_ready(ref_forward(x_high, x_low, params))
    if not bool(jnp.allclose(out, ref, atol=5e-3, rtol=5e-3)):
        max_err = float(jnp.max(jnp.abs(out - ref)))
        raise AssertionError(f"mismatch vs reference, max abs err = {max_err}")

    print("KERNEL_OK")
</pallas_src>

<mosaic_0001>
module attributes {stable_mosaic.version = 11 : i64} {
  func.func @_asym_fusion_kernel(%arg0: i32, %arg1: memref<1x8x256xbf16, #tpu.memory_space<vmem>>, %arg2: memref<1x8x256xbf16, #tpu.memory_space<vmem>>, %arg3: memref<8x8xbf16, #tpu.memory_space<vmem>>, %arg4: memref<8x1xf32, #tpu.memory_space<vmem>>, %arg5: memref<2x8xbf16, #tpu.memory_space<vmem>>, %arg6: memref<2x1xf32, #tpu.memory_space<vmem>>, %arg7: memref<8x2xbf16, #tpu.memory_space<vmem>>, %arg8: memref<8x1xf32, #tpu.memory_space<vmem>>, %arg9: memref<2x8xbf16, #tpu.memory_space<vmem>>, %arg10: memref<2x1xf32, #tpu.memory_space<vmem>>, %arg11: memref<8x2xbf16, #tpu.memory_space<vmem>>, %arg12: memref<8x1xf32, #tpu.memory_space<vmem>>, %arg13: memref<8x72xbf16, #tpu.memory_space<vmem>>, %arg14: memref<8x1xf32, #tpu.memory_space<vmem>>, %arg15: memref<1x8x256xf32, #tpu.memory_space<vmem>>) attributes {dimension_semantics = [#tpu.dimension_semantics<parallel>], iteration_bounds = array<i64: 2>, scalar_prefetch = 0 : i64, scratch_operands = 0 : i64, tpu.core_type = #tpu.core_type<tc>, window_params = [{transform_indices = @transform_0, window_bounds = array<i64: 1, 8, 256>}, {transform_indices = @transform_1, window_bounds = array<i64: 1, 8, 256>}, {pipeline_mode = #tpu.pipeline_mode<synchronous>, transform_indices = @transform_2, window_bounds = array<i64: 8, 8>}, {pipeline_mode = #tpu.pipeline_mode<synchronous>, transform_indices = @transform_3, window_bounds = array<i64: 8, 1>}, {pipeline_mode = #tpu.pipeline_mode<synchronous>, transform_indices = @transform_4, window_bounds = array<i64: 2, 8>}, {pipeline_mode = #tpu.pipeline_mode<synchronous>, transform_indices = @transform_5, window_bounds = array<i64: 2, 1>}, {pipeline_mode = #tpu.pipeline_mode<synchronous>, transform_indices = @transform_6, window_bounds = array<i64: 8, 2>}, {pipeline_mode = #tpu.pipeline_mode<synchronous>, transform_indices = @transform_7, window_bounds = array<i64: 8, 1>}, {pipeline_mode = #tpu.pipeline_mode<synchronous>, transform_indices = @transform_8, window_bounds = array<i64: 2, 8>}, {pipeline_mode = #tpu.pipeline_mode<synchronous>, transform_indices = @transform_9, window_bounds = array<i64: 2, 1>}, {pipeline_mode = #tpu.pipeline_mode<synchronous>, transform_indices = @transform_10, window_bounds = array<i64: 8, 2>}, {pipeline_mode = #tpu.pipeline_mode<synchronous>, transform_indices = @transform_11, window_bounds = array<i64: 8, 1>}, {pipeline_mode = #tpu.pipeline_mode<synchronous>, transform_indices = @transform_12, window_bounds = array<i64: 8, 72>}, {pipeline_mode = #tpu.pipeline_mode<synchronous>, transform_indices = @transform_13, window_bounds = array<i64: 8, 1>}, {transform_indices = @transform_14, window_bounds = array<i64: 1, 8, 256>}]} {
    %c0 = arith.constant 0 : index
    %c0_0 = arith.constant 0 : index
    %c0_1 = arith.constant 0 : index
    %0 = vector.load %arg1[%c0, %c0_0, %c0_1] : memref<1x8x256xbf16, #tpu.memory_space<vmem>>, vector<1x8x256xbf16>
    %1 = vector.shape_cast %0 : vector<1x8x256xbf16> to vector<8x256xbf16>
    %c0_2 = arith.constant 0 : index
    %c0_3 = arith.constant 0 : index
    %c0_4 = arith.constant 0 : index
    %2 = vector.load %arg2[%c0_2, %c0_3, %c0_4] : memref<1x8x256xbf16, #tpu.memory_space<vmem>>, vector<1x8x256xbf16>
    %3 = vector.shape_cast %2 : vector<1x8x256xbf16> to vector<8x256xbf16>
    %c0_5 = arith.constant 0 : index
    %c0_6 = arith.constant 0 : index
    %4 = vector.load %arg3[%c0_5, %c0_6] : memref<8x8xbf16, #tpu.memory_space<vmem>>, vector<8x8xbf16>
    %cst = arith.constant dense<0.000000e+00> : vector<8x256xf32>
    %5 = tpu.matmul %4, %1, %cst {dimension_numbers = #tpu.dot_dimension_numbers<[1], [0], [0], [1], [0, 0, 1, 1], [], []>} : vector<8x8xbf16>, vector<8x256xbf16>, vector<8x256xf32> -> vector<8x256xf32>
    %c0_7 = arith.constant 0 : index
    %c0_8 = arith.constant 0 : index
    %6 = vector.load %arg4[%c0_7, %c0_8] : memref<8x1xf32, #tpu.memory_space<vmem>>, vector<8x1xf32>
    %7 = vector.broadcast %6 : vector<8x1xf32> to vector<8x256xf32>
    %8 = arith.addf %5, %7 : vector<8x256xf32>
    %cst_9 = arith.constant 0.000000e+00 : f32
    %9 = vector.broadcast %cst_9 : f32 to vector<8x256xf32>
    %10 = arith.maximumf %8, %9 : vector<8x256xf32>
    %c0_10 = arith.constant 0 : index
    %c0_11 = arith.constant 0 : index
    %11 = vector.load %arg5[%c0_10, %c0_11] : memref<2x8xbf16, #tpu.memory_space<vmem>>, vector<2x8xbf16>
    %cst_12 = arith.constant dense<0.000000e+00> : vector<2x256xf32>
    %12 = tpu.matmul %11, %3, %cst_12 {dimension_numbers = #tpu.dot_dimension_numbers<[1], [0], [0], [1], [0, 0, 1, 1], [], []>} : vector<2x8xbf16>, vector<8x256xbf16>, vector<2x256xf32> -> vector<2x256xf32>
    %c0_13 = arith.constant 0 : index
    %c0_14 = arith.constant 0 : index
    %13 = vector.load %arg6[%c0_13, %c0_14] : memref<2x1xf32, #tpu.memory_space<vmem>>, vector<2x1xf32>
    %14 = vector.broadcast %13 : vector<2x1xf32> to vector<2x256xf32>
    %15 = arith.addf %12, %14 : vector<2x256xf32>
    %cst_15 = arith.constant 0.000000e+00 : f32
    %16 = vector.broadcast %cst_15 : f32 to vector<2x256xf32>
    %17 = arith.maximumf %15, %16 : vector<2x256xf32>
    %c0_16 = arith.constant 0 : index
    %c0_17 = arith.constant 0 : index
    %18 = vector.load %arg7[%c0_16, %c0_17] : memref<8x2xbf16, #tpu.memory_space<vmem>>, vector<8x2xbf16>
    %19 = arith.truncf %17 : vector<2x256xf32> to vector<2x256xbf16>
    %cst_18 = arith.constant dense<0.000000e+00> : vector<8x256xf32>
    %20 = tpu.matmul %18, %19, %cst_18 {dimension_numbers = #tpu.dot_dimension_numbers<[1], [0], [0], [1], [0, 0, 1, 1], [], []>} : vector<8x2xbf16>, vector<2x256xbf16>, vector<8x256xf32> -> vector<8x256xf32>
    %c0_19 = arith.constant 0 : index
    %c0_20 = arith.constant 0 : index
    %21 = vector.load %arg8[%c0_19, %c0_20] : memref<8x1xf32, #tpu.memory_space<vmem>>, vector<8x1xf32>
    %22 = vector.broadcast %21 : vector<8x1xf32> to vector<8x256xf32>
    %23 = arith.addf %20, %22 : vector<8x256xf32>
    %cst_21 = arith.constant 0.000000e+00 : f32
    %24 = vector.broadcast %cst_21 : f32 to vector<8x256xf32>
    %25 = arith.subf %24, %23 : vector<8x256xf32>
    %26 = math.exp %25 : vector<8x256xf32>
    %cst_22 = arith.constant 1.000000e+00 : f32
    %27 = vector.broadcast %cst_22 : f32 to vector<8x256xf32>
    %28 = arith.addf %27, %26 : vector<8x256xf32>
    %29 = tpu.reciprocal %28 : vector<8x256xf32> -> vector<8x256xf32>
    %cst_23 = arith.constant dense<0.000000e+00> : vector<8xf32>
    %30 = vector.multi_reduction <add>, %10, %cst_23 [1] : vector<8x256xf32> to vector<8xf32>
    %31 = vector.shape_cast %30 : vector<8xf32> to vector<8x1xf32>
    %cst_24 = arith.constant 2.560000e+02 : f32
    %32 = vector.broadcast %cst_24 : f32 to vector<8x1xf32>
    %33 = arith.divf %31, %32 : vector<8x1xf32>
    %34 = vector.shape_cast %33 : vector<8x1xf32> to vector<8x1xf32>
    %35 = vector.broadcast %34 : vector<8x1xf32> to vector<8x128xf32>
    %36 = arith.truncf %35 : vector<8x128xf32> to vector<8x128xbf16>
    %c0_25 = arith.constant 0 : index
    %c0_26 = arith.constant 0 : index
    %37 = vector.load %arg9[%c0_25, %c0_26] : memref<2x8xbf16, #tpu.memory_space<vmem>>, vector<2x8xbf16>
    %cst_27 = arith.constant dense<0.000000e+00> : vector<2x128xf32>
    %38 = tpu.matmul %37, %36, %cst_27 {dimension_numbers = #tpu.dot_dimension_numbers<[1], [0], [0], [1], [0, 0, 1, 1], [], []>} : vector<2x8xbf16>, vector<8x128xbf16>, vector<2x128xf32> -> vector<2x128xf32>
    %c0_28 = arith.constant 0 : index
    %c0_29 = arith.constant 0 : index
    %39 = vector.load %arg10[%c0_28, %c0_29] : memref<2x1xf32, #tpu.memory_space<vmem>>, vector<2x1xf32>
    %40 = vector.broadcast %39 : vector<2x1xf32> to vector<2x128xf32>
    %41 = arith.addf %38, %40 : vector<2x128xf32>
    %cst_30 = arith.constant 0.000000e+00 : f32
    %42 = vector.broadcast %cst_30 : f32 to vector<2x128xf32>
    %43 = arith.maximumf %41, %42 : vector<2x128xf32>
    %c0_31 = arith.constant 0 : index
    %c0_32 = arith.constant 0 : index
    %44 = vector.load %arg11[%c0_31, %c0_32] : memref<8x2xbf16, #tpu.memory_space<vmem>>, vector<8x2xbf16>
    %45 = arith.truncf %43 : vector<2x128xf32> to vector<2x128xbf16>
    %cst_33 = arith.constant dense<0.000000e+00> : vector<8x128xf32>
    %46 = tpu.matmul %44, %45, %cst_33 {dimension_numbers = #tpu.dot_dimension_numbers<[1], [0], [0], [1], [0, 0, 1, 1], [], []>} : vector<8x2xbf16>, vector<2x128xbf16>, vector<8x128xf32> -> vector<8x128xf32>
    %c0_34 = arith.constant 0 : index
    %c0_35 = arith.constant 0 : index
    %47 = vector.load %arg12[%c0_34, %c0_35] : memref<8x1xf32, #tpu.memory_space<vmem>>, vector<8x1xf32>
    %48 = vector.broadcast %47 : vector<8x1xf32> to vector<8x128xf32>
    %49 = arith.addf %46, %48 : vector<8x128xf32>
    %cst_36 = arith.constant 0.000000e+00 : f32
    %50 = vector.broadcast %cst_36 : f32 to vector<8x128xf32>
    %51 = arith.subf %50, %49 : vector<8x128xf32>
    %52 = math.exp %51 : vector<8x128xf32>
    %cst_37 = arith.constant 1.000000e+00 : f32
    %53 = vector.broadcast %cst_37 : f32 to vector<8x128xf32>
    %54 = arith.addf %53, %52 : vector<8x128xf32>
    %55 = tpu.reciprocal %54 : vector<8x128xf32> -> vector<8x128xf32>
    %56 = vector.extract_strided_slice %55 {offsets = [0, 0], sizes = [8, 1], strides = [1, 1]} : vector<8x128xf32> to vector<8x1xf32>
    %57 = arith.extf %3 : vector<8x256xbf16> to vector<8x256xf32>
    %58 = arith.addf %57, %10 : vector<8x256xf32>
    %59 = tpu.iota {dimensions = array<i32: 1>} : vector<1x256xi32>
    %c15_i32 = arith.constant 15 : i32
    %60 = vector.broadcast %c15_i32 : i32 to vector<1x256xi32>
    %61 = arith.andi %59, %60 : vector<1x256xi32>
    %c16_i32 = arith.constant 16 : i32
    %62 = vector.broadcast %c16_i32 : i32 to vector<1x256xi32>
    %63 = arith.cmpi sge, %59, %62 : vector<1x256xi32>
    %c240_i32 = arith.constant 240 : i32
    %64 = vector.broadcast %c240_i32 : i32 to vector<1x256xi32>
    %65 = arith.cmpi slt, %59, %64 : vector<1x256xi32>
    %c1_i32 = arith.constant 1 : i32
    %66 = vector.broadcast %c1_i32 : i32 to vector<1x256xi32>
    %67 = arith.cmpi sge, %61, %66 : vector<1x256xi32>
    %c15_i32_38 = arith.constant 15 : i32
    %68 = vector.broadcast %c15_i32_38 : i32 to vector<1x256xi32>
    %69 = arith.cmpi slt, %61, %68 : vector<1x256xi32>
    %c17_i32 = arith.constant 17 : i32
    %70 = tpu.dynamic_rotate %58 by %c17_i32 dim 1 : vector<8x256xf32>, i32 -> vector<8x256xf32>
    %71 = arith.andi %63, %67 : vector<1x256xi1>
    %cst_39 = arith.constant 0.000000e+00 : f32
    %72 = vector.shape_cast %71 : vector<1x256xi1> to vector<1x256xi1>
    %73 = vector.broadcast %72 : vector<1x256xi1> to vector<8x256xi1>
    %74 = vector.broadcast %cst_39 : f32 to vector<8x256xf32>
    %75 = arith.select %73, %70, %74 : vector<8x256xi1>, vector<8x256xf32>
    %c16_i32_40 = arith.constant 16 : i32
    %76 = tpu.dynamic_rotate %58 by %c16_i32_40 dim 1 : vector<8x256xf32>, i32 -> vector<8x256xf32>
    %cst_41 = arith.constant 0.000000e+00 : f32
    %77 = vector.shape_cast %63 : vector<1x256xi1> to vector<1x256xi1>
    %78 = vector.broadcast %77 : vector<1x256xi1> to vector<8x256xi1>
    %79 = vector.broadcast %cst_41 : f32 to vector<8x256xf32>
    %80 = arith.select %78, %76, %79 : vector<8x256xi1>, vector<8x256xf32>
    %c15_i32_42 = arith.constant 15 : i32
    %81 = tpu.dynamic_rotate %58 by %c15_i32_42 dim 1 : vector<8x256xf32>, i32 -> vector<8x256xf32>
    %82 = arith.andi %63, %69 : vector<1x256xi1>
    %cst_43 = arith.constant 0.000000e+00 : f32
    %83 = vector.shape_cast %82 : vector<1x256xi1> to vector<1x256xi1>
    %84 = vector.broadcast %83 : vector<1x256xi1> to vector<8x256xi1>
    %85 = vector.broadcast %cst_43 : f32 to vector<8x256xf32>
    %86 = arith.select %84, %81, %85 : vector<8x256xi1>, vector<8x256xf32>
    %c1_i32_44 = arith.constant 1 : i32
    %87 = tpu.dynamic_rotate %58 by %c1_i32_44 dim 1 : vector<8x256xf32>, i32 -> vector<8x256xf32>
    %cst_45 = arith.constant 0.000000e+00 : f32
    %88 = vector.shape_cast %67 : vector<1x256xi1> to vector<1x256xi1>
    %89 = vector.broadcast %88 : vector<1x256xi1> to vector<8x256xi1>
    %90 = vector.broadcast %cst_45 : f32 to vector<8x256xf32>
    %91 = arith.select %89, %87, %90 : vector<8x256xi1>, vector<8x256xf32>
    %c255_i32 = arith.constant 255 : i32
    %92 = tpu.dynamic_rotate %58 by %c255_i32 dim 1 : vector<8x256xf32>, i32 -> vector<8x256xf32>
    %cst_46 = arith.constant 0.000000e+00 : f32
    %93 = vector.shape_cast %69 : vector<1x256xi1> to vector<1x256xi1>
    %94 = vector.broadcast %93 : vector<1x256xi1> to vector<8x256xi1>
    %95 = vector.broadcast %cst_46 : f32 to vector<8x256xf32>
    %96 = arith.select %94, %92, %95 : vector<8x256xi1>, vector<8x256xf32>
    %c241_i32 = arith.constant 241 : i32
    %97 = tpu.dynamic_rotate %58 by %c241_i32 dim 1 : vector<8x256xf32>, i32 -> vector<8x256xf32>
    %98 = arith.andi %65, %67 : vector<1x256xi1>
    %cst_47 = arith.constant 0.000000e+00 : f32
    %99 = vector.shape_cast %98 : vector<1x256xi1> to vector<1x256xi1>
    %100 = vector.broadcast %99 : vector<1x256xi1> to vector<8x256xi1>
    %101 = vector.broadcast %cst_47 : f32 to vector<8x256xf32>
    %102 = arith.select %100, %97, %101 : vector<8x256xi1>, vector<8x256xf32>
    %c240_i32_48 = arith.constant 240 : i32
    %103 = tpu.dynamic_rotate %58 by %c240_i32_48 dim 1 : vector<8x256xf32>, i32 -> vector<8x256xf32>
    %cst_49 = arith.constant 0.000000e+00 : f32
    %104 = vector.shape_cast %65 : vector<1x256xi1> to vector<1x256xi1>
    %105 = vector.broadcast %104 : vector<1x256xi1> to vector<8x256xi1>
    %106 = vector.broadcast %cst_49 : f32 to vector<8x256xf32>
    %107 = arith.select %105, %103, %106 : vector<8x256xi1>, vector<8x256xf32>
    %c239_i32 = arith.constant 239 : i32
    %108 = tpu.dynamic_rotate %58 by %c239_i32 dim 1 : vector<8x256xf32>, i32 -> vector<8x256xf32>
    %109 = arith.andi %65, %69 : vector<1x256xi1>
    %cst_50 = arith.constant 0.000000e+00 : f32
    %110 = vector.shape_cast %109 : vector<1x256xi1> to vector<1x256xi1>
    %111 = vector.broadcast %110 : vector<1x256xi1> to vector<8x256xi1>
    %112 = vector.broadcast %cst_50 : f32 to vector<8x256xf32>
    %113 = arith.select %111, %108, %112 : vector<8x256xi1>, vector<8x256xf32>
    %114 = tpu.concatenate %75, %80, %86, %91, %58, %96, %102, %107, %113 in 0 : vector<8x256xf32>, vector<8x256xf32>, vector<8x256xf32>, vector<8x256xf32>, vector<8x256xf32>, vector<8x256xf32>, vector<8x256xf32>, vector<8x256xf32>, vector<8x256xf32> -> vector<72x256xf32>
    %115 = arith.truncf %114 : vector<72x256xf32> to vector<72x256xbf16>
    %c0_51 = arith.constant 0 : index
    %c0_52 = arith.constant 0 : index
    %116 = vector.load %arg13[%c0_51, %c0_52] : memref<8x72xbf16, #tpu.memory_space<vmem>>, vector<8x72xbf16>
    %cst_53 = arith.constant dense<0.000000e+00> : vector<8x256xf32>
    %117 = tpu.matmul %116, %115, %cst_53 {dimension_numbers = #tpu.dot_dimension_numbers<[1], [0], [0], [1], [0, 0, 1, 1], [], []>} : vector<8x72xbf16>, vector<72x256xbf16>, vector<8x256xf32> -> vector<8x256xf32>
    %c0_54 = arith.constant 0 : index
    %c0_55 = arith.constant 0 : index
    %118 = vector.load %arg14[%c0_54, %c0_55] : memref<8x1xf32, #tpu.memory_space<vmem>>, vector<8x1xf32>
    %119 = vector.broadcast %118 : vector<8x1xf32> to vector<8x256xf32>
    %120 = arith.addf %117, %119 : vector<8x256xf32>
    %cst_56 = arith.constant 0.000000e+00 : f32
    %121 = vector.broadcast %cst_56 : f32 to vector<8x256xf32>
    %122 = arith.maximumf %120, %121 : vector<8x256xf32>
    %123 = vector.broadcast %56 : vector<8x1xf32> to vector<8x256xf32>
    %124 = arith.mulf %122, %123 : vector<8x256xf32>
    %125 = arith.mulf %124, %29 : vector<8x256xf32>
    %c0_57 = arith.constant 0 : index
    %c0_58 = arith.constant 0 : index
    %c0_59 = arith.constant 0 : index
    %126 = vector.load %arg15[%c0_57, %c0_58, %c0_59] : memref<1x8x256xf32, #tpu.memory_space<vmem>>, vector<1x8x256xf32>
    %127 = vector.shape_cast %126 : vector<1x8x256xf32> to vector<8x256xf32>
    %128 = vector.shape_cast %125 : vector<8x256xf32> to vector<1x8x256xf32>
    tpu.vector_store %arg15[%c0_57, %c0_58, %c0_59], %128 {strides = array<i32>} : memref<1x8x256xf32, #tpu.memory_space<vmem>>, vector<1x8x256xf32>,
    return
  }
  func.func @transform_0(%arg0: i32) -> (i32, i32, i32) {
    %c0_i32 = arith.constant 0 : i32
    %c0_i32_0 = arith.constant 0 : i32
    %c0_i32_1 = arith.constant 0 : i32
    return %arg0, %c0_i32, %c0_i32_0 : i32, i32, i32
  }
  func.func @transform_1(%arg0: i32) -> (i32, i32, i32) {
    %c0_i32 = arith.constant 0 : i32
    %c0_i32_0 = arith.constant 0 : i32
    %c0_i32_1 = arith.constant 0 : i32
    return %arg0, %c0_i32, %c0_i32_0 : i32, i32, i32
  }
  func.func @transform_2(%arg0: i32) -> (i32, i32) {
    %c0_i32 = arith.constant 0 : i32
    %c0_i32_0 = arith.constant 0 : i32
    %c0_i32_1 = arith.constant 0 : i32
    return %c0_i32, %c0_i32_0 : i32, i32
  }
  func.func @transform_3(%arg0: i32) -> (i32, i32) {
    %c0_i32 = arith.constant 0 : i32
    %c0_i32_0 = arith.constant 0 : i32
    %c0_i32_1 = arith.constant 0 : i32
    return %c0_i32, %c0_i32_0 : i32, i32
  }
  func.func @transform_4(%arg0: i32) -> (i32, i32) {
    %c0_i32 = arith.constant 0 : i32
    %c0_i32_0 = arith.constant 0 : i32
    %c0_i32_1 = arith.constant 0 : i32
    return %c0_i32, %c0_i32_0 : i32, i32
  }
  func.func @transform_5(%arg0: i32) -> (i32, i32) {
    %c0_i32 = arith.constant 0 : i32
    %c0_i32_0 = arith.constant 0 : i32
    %c0_i32_1 = arith.constant 0 : i32
    return %c0_i32, %c0_i32_0 : i32, i32
  }
  func.func @transform_6(%arg0: i32) -> (i32, i32) {
    %c0_i32 = arith.constant 0 : i32
    %c0_i32_0 = arith.constant 0 : i32
    %c0_i32_1 = arith.constant 0 : i32
    return %c0_i32, %c0_i32_0 : i32, i32
  }
  func.func @transform_7(%arg0: i32) -> (i32, i32) {
    %c0_i32 = arith.constant 0 : i32
    %c0_i32_0 = arith.constant 0 : i32
    %c0_i32_1 = arith.constant 0 : i32
    return %c0_i32, %c0_i32_0 : i32, i32
  }
  func.func @transform_8(%arg0: i32) -> (i32, i32) {
    %c0_i32 = arith.constant 0 : i32
    %c0_i32_0 = arith.constant 0 : i32
    %c0_i32_1 = arith.constant 0 : i32
    return %c0_i32, %c0_i32_0 : i32, i32
  }
  func.func @transform_9(%arg0: i32) -> (i32, i32) {
    %c0_i32 = arith.constant 0 : i32
    %c0_i32_0 = arith.constant 0 : i32
    %c0_i32_1 = arith.constant 0 : i32
    return %c0_i32, %c0_i32_0 : i32, i32
  }
  func.func @transform_10(%arg0: i32) -> (i32, i32) {
    %c0_i32 = arith.constant 0 : i32
    %c0_i32_0 = arith.constant 0 : i32
    %c0_i32_1 = arith.constant 0 : i32
    return %c0_i32, %c0_i32_0 : i32, i32
  }
  func.func @transform_11(%arg0: i32) -> (i32, i32) {
    %c0_i32 = arith.constant 0 : i32
    %c0_i32_0 = arith.constant 0 : i32
    %c0_i32_1 = arith.constant 0 : i32
    return %c0_i32, %c0_i32_0 : i32, i32
  }
  func.func @transform_12(%arg0: i32) -> (i32, i32) {
    %c0_i32 = arith.constant 0 : i32
    %c0_i32_0 = arith.constant 0 : i32
    %c0_i32_1 = arith.constant 0 : i32
    return %c0_i32, %c0_i32_0 : i32, i32
  }
  func.func @transform_13(%arg0: i32) -> (i32, i32) {
    %c0_i32 = arith.constant 0 : i32
    %c0_i32_0 = arith.constant 0 : i32
    %c0_i32_1 = arith.constant 0 : i32
    return %c0_i32, %c0_i32_0 : i32, i32
  }
  func.func @transform_14(%arg0: i32) -> (i32, i32, i32) {
    %c0_i32 = arith.constant 0 : i32
    %c0_i32_0 = arith.constant 0 : i32
    %c0_i32_1 = arith.constant 0 : i32
    return %arg0, %c0_i32, %c0_i32_0 : i32, i32, i32
  }
}

</mosaic_0001>

<bundles_post_ra>
// kernel: tpu_custom_call.1
= control target key start
LH: loop header
LB: loop body
LE: loop exit
PB: predicated region body
PF: predicated region fallthrough
CT: control target
= control target key end

     0   :  { %s1744_s0 = inlined_call_operand.vmem [shape: bf16[2,8,256], index: 0, kind: input, shape index: {}]   ;;  %s1745_s1 = inlined_call_operand.vmem [shape: bf16[2,8,256], index: 1, kind: input, shape index: {}]   ;;  %s1746_s2 = inlined_call_operand.vmem [shape: bf16[8,8], index: 2, kind: input, shape index: {}]   ;;  %s1747_s3 = inlined_call_operand.vmem [shape: f32[8,1], index: 3, kind: input, shape index: {}]   ;;  %s1748_s4 = inlined_call_operand.vmem [shape: bf16[2,8], index: 4, kind: input, shape index: {}]   ;;  %s1749_s5 = inlined_call_operand.vmem [shape: f32[2,1], index: 5, kind: input, shape index: {}]   ;;  %s1750_s6 = inlined_call_operand.vmem [shape: bf16[8,2], index: 6, kind: input, shape index: {}]   ;;  %s1751_s7 = inlined_call_operand.vmem [shape: f32[8,1], index: 7, kind: input, shape index: {}]   ;;  %s1752_s8 = inlined_call_operand.vmem [shape: bf16[2,8], index: 8, kind: input, shape index: {}]   ;;  %s1753_s9 = inlined_call_operand.vmem [shape: f32[2,1], index: 9, kind: input, shape index: {}]   ;;  %s1754_s10 = inlined_call_operand.vmem [shape: bf16[8,2], index: 10, kind: input, shape index: {}]   ;;  %s1755_s11 = inlined_call_operand.vmem [shape: f32[8,1], index: 11, kind: input, shape index: {}]   ;;  %s1756_s12 = inlined_call_operand.vmem [shape: bf16[8,72], index: 12, kind: input, shape index: {}]   ;;  %s1757_s13 = inlined_call_operand.vmem [shape: f32[8,1], index: 13, kind: input, shape index: {}]   ;;  %s1758_s14 = inlined_call_operand.hbm [shape: f32[2,8,256], index: 14, kind: output, shape index: {}]  }
   0x1   :  { %1764 = sst [smem:[#allocation9_spill]] %s1747_s3 }
   0x2   :  { %19 = vsyncpa [#allocation3], 0 }
   0x3   :  { %21 = vsyncpa [#allocation3 + $0x1], 0  ;;  %s1437_s29 = smov 0   ;;  %s1439_s30 = smov 0  }
   0x4   :  { %s1441_s15 = smov 0   ;;  %s1443_s16 = smov 0  }
   0x5 LB: > { %1765 = sst [smem:[#allocation5_spill]] %s1343_s15  ;;  %s1458_s17 = sadd.s32 4294967295, %s1347_s16   ;;  %s1347_s16 = sphi %s1443_s16, %s1788_s16   ;;  %s1343_s15 = sphi %s1441_s15, %s1793_s15   ;;  %s1339_s30 = sphi %s1439_s30, %s1792_s30   ;;  %s1335_s29 = sphi %s1437_s29, %s1791_s29  }
   0x6   : > { %s1105_s18 = sadd.s32 4294967294, %s1347_s16   ;;  %s1462_s19 = sadd.s32 1, %s1347_s16  }
   0x7   : > { %1766 = sst [smem:[#allocation6_spill]] %s1462_s19  ;;  %s338_s20 = sadd.s32 1, %s1343_s15 }
   0x8   : > { %s335_s21 = ssub.s32 %s1347_s16, %s1462_s19  ;;  %p348_p0 = scmp.ne.s32.totalorder %s1343_s15, %s1339_s30 }
   0x9   : > { %p336_p1 = scmp.eq.s32.totalorder %s335_s21, 0  ;;  %p349_p2 = scmp.eq.s32.totalorder %s1458_s17, 1 }
   0xa   : > { %p354_p3 = scmp.ne.s32.totalorder %s1339_s30, %s1335_s29  ;;  %p355_p4 = scmp.eq.s32.totalorder %s1105_s18, 1 }
   0xb   : > { %s1473_s22 = scalar_select %p336_p1, %s1343_s15, %s338_s20  }
   0xc   : > { %p1475_p5 = por %p349_p2, %p348_p0  ;;  %p1479_p6 = por %p355_p4, %p354_p3 }
   0xd   : > { %1767 = sst [smem:[#allocation7_spill]] %s1473_s22  ;;  %p1108_p7 = scmp.ge.s32.totalorder %s1347_s16, 1 }
   0xe   : > { %s1769_s24 = scalar_select %p1479_p6, 1, 0 }
   0xf   : > { %p425_p8 = scmp.lt.s32.totalorder %s1347_s16, 3 }
  0x10   : > { %1770 = sst [smem:[#allocation8_spill]] %s1769_s24 }
  0x11   : > { %p426_p9 = pnand %p1108_p7, %p425_p8 }
  0x12   : > { %p476_p10 = scmp.lt.s32.totalorder (!%p426_p9), %s1458_s17, 1  ;;  %v1349_v0 = vmov (!%p426_p9), 0   ;;  %s1771_s3 = sld [smem:[#allocation9_spill]] (!%p426_p9)  ;;  %v556_v2 = vld [vmem:[%s1749_s5] sm:$0x3] (!%p426_p9)  ;;  %vm505_vm0 = vcmask (!%p426_p9), 1043456   ;;  %v813_v50 = vlaneseq (!%p426_p9) }
  0x13   : > { %429 = sbr.rel (%p426_p9) target bundleno = 1016 (0x3f8), region = 76  ;;  %544 = vmatprep.mubr.bf16.mxu0 (!%p426_p9), %v1349_v0  ;;  %1227 = vset.pattern.permute.xlu0 (!%p426_p9), %v1349_v0  ;;  %v697_v3 = vld [vmem:[%s1753_s9] sm:$0x3] (!%p426_p9)  ;;  %vm501_vm1 = vcmask (!%p426_p9), 64512   ;;  %s1351_s27 = smov (!%p426_p9), 16   ;;  %vm632_vm2 = vcmask (!%p426_p9), 1040384  }
  0x14   : > { %1228 = vset.pattern.permute.xlu1 (!%p426_p9), %v1349_v0  ;;  %v489_v11 = vld [vmem:[%s1746_s2] sm:$0xf] (!%p426_p9)  ;;  %s1352_s28 = smov (!%p426_p9), 15   ;;  %vm1763_vm3 = vcmask (!%p426_p9), 15360   ;;  %s1353_s21 = smov (!%p426_p9), 1   ;;  %v1355_v42 = vmov (!%p426_p9), 0.0  }
  0x15   : > { %559 = vperm.xlu1 (!%p426_p9), %1228, %v556_v2   ;;  %v555_v13 = vld [vmem:[%s1748_s4] sm:$0x1] (!%p426_p9)  ;;  %s1354_s25 = smov (!%p426_p9), 127   ;;  %1164 = vmatprep.subr.bf16.mxu1 (!%p426_p9), %v1355_v42  ;;  %vm1356_vm4 = vmmov (!%p426_p9), 0   ;;  %s1357_s26 = smov (!%p426_p9), 113   ;;  %v1544_v52 = vand.u32 (!%p426_p9), 127, %v813_v50 }
  0x16   : > { %v619_v41 = vld [vmem:[%s1750_s6] sm:$0xf] (!%p426_p9)  ;;  %1166 = vmatprep.mubr.msk.bf16.mxu1 (!%p426_p9), %vm1356_vm4, %v1355_v42  ;;  %s1358_s22 = smov (!%p426_p9), 111   ;;  %s1359_s15 = smov (!%p426_p9), 112   ;;  %vm1360_vm12 = vmmov (!%p426_p9), 1  }
  0x17   : > { %v752_v43 = vld [vmem:[%s1755_s11] sm:$0xff] (!%p426_p9)  ;;  %v1547_v53 = vadd.s32 (!%p426_p9), 128, %v1544_v52  ;;  %v816_v55 = vand.u32 (!%p426_p9), 15, %v1544_v52  ;;  %vm845_vm5 = vcmp.lt.s32.totalorder (!%p426_p9), %v1544_v52, 16  ;;  %vm818_vm6 = vcmp.ge.s32.totalorder (!%p426_p9), %v1544_v52, 16 }
  0x18   : > { %v490_v1 = vld [vmem:[%s1771_s3] sm:$0xff] (!%p426_p9)  ;;  %vm830_vm8 = vcmp.lt.s32.totalorder (!%p426_p9), %v1544_v52, 17  ;;  %vm873_vm10 = vcmp.lt.s32.totalorder (!%p426_p9), %v1544_v52, 1  ;;  %vm858_vm14 = vcmp.lt.s32.totalorder (!%p426_p9), %v1544_v52, 15 }
  0x19   : > { %493 = vperm.xlu0 (!%p426_p9), %1227, %v490_v1   ;;  %700 = vperm.xlu1 (!%p426_p9), %1228, %v697_v3   ;;  %v622_v44 = vld [vmem:[%s1751_s7] sm:$0xff] (!%p426_p9)  ;;  %v817_v56 = vand.u32 (!%p426_p9), 15, %v1547_v53  ;;  %vm1555_vm7 = vcmp.ge.s32.totalorder (!%p426_p9), %v816_v55, 1 }
  0x1a   : > { %s477_s18 = scalar_select %p476_p10, %s1458_s17, 1  ;;  %v949_v45 = vld [vmem:[%s1757_s13] sm:$0xff]  ;;  %vm1573_vm11 = vmand %vm818_vm6, %vm1555_vm7 }
  0x1b   : > { %vm1562_vm9 = vcmp.ge.s32.totalorder %v817_v56, 1  ;;  %vm1599_vm15 = vmpackc.low %vm818_vm6, %vm1573_vm11  ;;  %vm1614_vm11 = vcmp.lt.s32.totalorder %v816_v55, 15  ;;  %v948_v55 = vld [vmem:[%s1756_s12] sm:$0xf] }
  0x1c   : > { %s1157_s20 = sshll.u32 %s477_s18, 3  ;;  %vm1126_vm13 = vmpackc.low %vm1360_vm12, %vm1562_vm9 }
  0x1d   : > { %s480_s24 = scalar_lea.vmem %s1744_s0, %s1157_s20  ;;  %s485_s3 = scalar_lea.vmem %s1745_s1, %s1157_s20 }
  0x1e   : > { %v487_v4 = vld [vmem:[%s480_s24] sm:$0xff]  ;;  %s1350_s24 = smov 17  }
  0x1f   : > { %v488_v5 = vld [vmem:[%s485_s3] sm:$0xff]  ;;  %v1115_v6 = vcombine.high %v487_v4, %v487_v4  ;;  %v1114_v7 = vcombine.low %v487_v4, %v487_v4  ;;  %s473_s3 = sand.u32 1, %s1339_s30  }
  0x20   : > { %v1119_v8 = vcombine.high %v488_v5, %v488_v5  ;;  %v1118_v9 = vcombine.low %v488_v5, %v488_v5  ;;  %v809_v17 = vunpack.c.l.bf16 %v488_v5  ;;  %v810_v20 = vunpack.c.h.bf16 %v488_v5  ;;  %s1109_s19 = sshll.u32 %s473_s3, 4 }
  0x21   : > { %1116 = vmatprep.subr.msk.bf16.mxu0 %vm505_vm0, %v1115_v6  ;;  %v507_v10 = vsel %vm505_vm0, %v1114_v7, 0 }
  0x22   : > { %513 = vmatpush1.bf16.msra.mxu0 %v507_v10  ;;  %v571_v12 = vsel %vm505_vm0, %v1118_v9, 0 }
  0x23   : > { %1120 = vmatprep.subr.msk.bf16.mxu0 %vm505_vm0, %v1119_v8 }
  0x25   : > { %1117 = vmatmul.mubr.msk.bf16.vlgmr.msra.gmra.mrb[0].mxu0 %vm501_vm1, %v489_v11 }
  0x26   : > { %577 = vmatpush1.bf16.msra.mxu0 %v571_v12  ;;  %608 = vmatprep.mubr.bf16.mxu0 %v1349_v0 }
  0x2d   : > { %1121 = vmatmul.mubr.msk.bf16.vlgmr.msra.gmra.mrb[4].mxu0 %vm501_vm1, %v555_v13 }
  0x2e   : > { %671 = vmatprep.mubr.bf16.mxu0 %v1349_v0 }
  0x94   : > { %v560_v30 = vpop.permute.xlu1 %559 }
  0x98   : > { %v494_v14 = vpop.permute.xlu0 %493  ;;  %v1540_v46 = vpop.permute.xlu1 %700 }
  0xf8   : > { %v546_v15 = vpop.f32.mrb[0].mxu0 }
  0xf9   : > { %v547_v16 = vadd.f32 %v546_v15, %v494_v14  ;;  %v548_v18 = vpop.f32.mrb[1].mxu0 }
  0xfa   : > { %v549_v19 = vadd.f32 %v548_v18, %v494_v14  ;;  %v550_v21 = vpop.f32.mrb[2].mxu0 }
  0xfb   : > { %v553_v22 = vmax.f32 %v547_v16, 0.0  ;;  %v551_v23 = vpop.f32.mrb[3].mxu0 }
  0xfc   : > { %v554_v24 = vmax.f32 %v549_v19, 0.0 }
  0xfd   : > { %v1519_v25 = vadd.f32 %v809_v17, %v553_v22  ;;  %v696_v17 = vld [vmem:[%s1752_s8] sm:$0x1] }
  0xfe   : > { %v1521_v26 = vadd.f32 %v810_v20, %v554_v24  ;;  %v690_v27 = vadd.f32 %v554_v24, %v553_v22 }
 0x100   : > { %691 = vadd.xlane.f32.xlu0 %v690_v27  ;;  %v1229_v28 = vpack.i.bf16 %v1521_v26, %v1519_v25  ;;  %v610_v29 = vpop.f32.mrb[4].mxu0 }
 0x101   : > { %v612_v31 = vpop.f32.mrb[5].mxu0  ;;  %v611_v32 = vadd.f32 %v610_v29, %v560_v30 }
 0x102   : > { %1230 = vrot.lane.b32.xlu1 %v1229_v28, %s1350_s24  ;;  %v613_v33 = vadd.f32 %v612_v31, %v560_v30  ;;  %v614_v34 = vpop.f32.mrb[6].mxu0  ;;  %s1159_s24 = sshll.u32 %s1458_s17, 8  ;;  %s1020_s17 = scalar_lea.sflag [#allocation3], %s473_s3 }
 0x103   : > { %v615_v35 = vpop.f32.mrb[7].mxu0  ;;  %v617_v36 = vmax.f32 %v611_v32, 0.0 }
 0x104   : > { %v618_v37 = vmax.f32 %v613_v33, 0.0 }
 0x105   : > { %v620_v38 = vpack.c.bf16 %v617_v36, %v617_v36 }
 0x106   : > { %1235 = vrot.lane.b32.xlu1 %v1229_v28, %s1351_s27  ;;  %v621_v39 = vpack.c.bf16 %v618_v37, %v618_v37  ;;  %s475_s27 = scalar_lea.vmem [#allocation2], %s1109_s19 }
 0x107   : > { %v634_v40 = vsel %vm632_vm2, %v620_v38, 0 }
 0x108   : > { %1122 = vmatprep.subr.msk.bf16.mxu0 %vm632_vm2, %v621_v39 }
 0x109   : > { %640 = vmatpush1.bf16.msra.mxu0 %v634_v40 }
 0x10a   : > { %1240 = vrot.lane.b32.xlu1 %v1229_v28, %s1352_s28  ;;  %1170 = vmatprep.subr.bf16.mxu0 %v1355_v42  ;;  %s1034_s28 = sshll.u32 %s475_s27, 4  ;;  %s1704_s28 = int_to_ptr.vmem [resolvable:$true] %s1034_s28 }
 0x10c   : > { %1123 = vmatmul.mubr.msk.bf16.vlgmr.msra.gmra.mrb[8].mxu0 %vm1763_vm3, %v619_v41 }
 0x10d   : > { %1172 = vmatprep.mubr.msk.bf16.mxu0 %vm1356_vm4, %v1355_v42  ;;  %vm1603_vm4 = vcmp.lt.s32.totalorder %v817_v56, 15 }
 0x10e   : > { %1245 = vrot.lane.b32.xlu1 %v1229_v28, %s1353_s21  ;;  %vm1132_vm3 = vmpackc.low %vm1562_vm9, %vm1603_vm4  ;;  %s1702_s21 = scalar_lea.hbm %s1758_s14, %s1159_s24 }
 0x112   : > { %1250 = vrot.lane.b32.xlu1 %v1229_v28, %s1354_s25  ;;  %s1285_s25 = scalar_lea.vmem %s1704_s28, 256 }
 0x113   : > { %p1286_p11 = scmp.ne.s32.totalorder %s1704_s28, %s1285_s25 }
 0x115   : > { %p1287_p12 = pnand %p1286_p11, %p1475_p5 }
 0x116   : > { %1255 = vrot.lane.b32.xlu1 %v1229_v28, %s1357_s26  ;;  %1265 = vrot.lane.b32.xlu0 %v1229_v28, %s1358_s22  ;;  %s1361_s26 = smov [#allocation2]  }
 0x117   : > { %p1288_p13 = pneg %p1287_p12  ;;  %s1289_s22 = sshll.u32 %s1361_s26, 4  ;;  %s1290_s22 = int_to_ptr.vmem [resolvable:$false] %s1289_s22 }
 0x118   : > { %p1292_p0 = scmp.lt.s32.totalorder %s1704_s28, %s1290_s22 }
 0x11a   : > { %1260 = vrot.lane.b32.xlu1 %v1229_v28, %s1359_s15  ;;  %s1291_s15 = scalar_lea.vmem %s1290_s22, 512 }
 0x11b   : > { %p1293_p1 = scmp.lt.s32.totalorder %s1291_s15, %s1285_s25 }
 0x11d   : > { %p1294_p2 = por %p1293_p1, %p1292_p0 }
 0x11e   : > { %755 = vperm.xlu1 %1228, %v752_v43  }
 0x11f   : > { %p1295_p3 = pnand %p1294_p2, %p1288_p13 }
 0x122   : > { %625 = vperm.xlu1 %1228, %v622_v44  }
 0x126   : > { %952 = vperm.xlu1 %1228, %v949_v45  }
 0x174   : > { %v1231_v47 = vpop.permute.xlu1 %1230 }
 0x175   : > { %v1233_v59 = vunpack.i.h.bf16 %v1231_v47  ;;  %v1232_v60 = vunpack.i.l.bf16 %v1231_v47 }
 0x177   : > { %v831_v8 = vsel %vm830_vm8, %v1232_v60, %v1233_v59  ;;  %v832_v20 = vsel %vm830_vm8, %v1233_v59, %v1232_v60  ;;  %vm1624_vm8 = vmand %vm818_vm6, %vm1614_vm11  ;;  %vm821_vm6 = vcmp.lt.s32.totalorder %v1547_v53, 240 }
 0x178   : > { %v1236_v48 = vpop.permute.xlu1 %1235 }
 0x179   : > { %v1238_v57 = vunpack.i.h.bf16 %v1236_v48  ;;  %v1237_v58 = vunpack.i.l.bf16 %v1236_v48 }
 0x17b   : > { %v846_v3 = vsel %vm845_vm5, %v1237_v58, %v1238_v57  ;;  %v847_v11 = vsel %vm845_vm5, %v1238_v57, %v1237_v58  ;;  %vm886_vm5 = vcmp.lt.s32.totalorder %v1544_v52, 127 }
 0x17c   : > { %v1542_v49 = vpop.permute.xlu1 %1240  ;;  %v1127_v12 = vpack.c.bf16 %v846_v3, %v831_v8  ;;  %v1130_v23 = vpack.c.bf16 %v847_v11, %v832_v20 }
 0x17d   : > { %v1243_v9 = vunpack.i.h.bf16 %v1542_v49  ;;  %v1242_v10 = vunpack.i.l.bf16 %v1542_v49 }
 0x17f   : > { %v859_v24 = vsel %vm858_vm14, %v1242_v10, %v1243_v9  ;;  %v860_v34 = vsel %vm858_vm14, %v1243_v9, %v1242_v10  ;;  %vm1138_vm14 = vmpackc.low %vm1603_vm4, %vm1360_vm12 }
 0x180   : > { %v1246_v51 = vpop.permute.xlu1 %1245 }
 0x181   : > { %v1248_v4 = vunpack.i.h.bf16 %v1246_v51  ;;  %v1247_v5 = vunpack.i.l.bf16 %v1246_v51 }
 0x183   : > { %v874_v14 = vsel %vm873_vm10, %v1247_v5, %v1248_v4  ;;  %v875_v29 = vsel %vm873_vm10, %v1248_v4, %v1247_v5  ;;  %vm927_vm10 = vcmp.lt.s32.totalorder %v1544_v52, 111  ;;  %v750_v4 = vld [vmem:[%s1754_s10] sm:$0xf] }
 0x184   : > { %v1549_v54 = vpop.permute.xlu1 %1250  ;;  %v1133_v30 = vpack.c.bf16 %v874_v14, %v859_v24  ;;  %v1136_v37 = vpack.c.bf16 %v875_v29, %v860_v34 }
 0x185   : > { %v1253_v15 = vunpack.i.h.bf16 %v1549_v54  ;;  %v1252_v16 = vunpack.i.l.bf16 %v1549_v54 }
 0x187   : > { %v888_v31 = vsel %vm886_vm5, %v1253_v15, %v1252_v16  ;;  %v887_v39 = vsel %vm886_vm5, %v1252_v16, %v1253_v15  ;;  %vm1141_vm5 = vmpackc.low %vm1614_vm11, %vm1360_vm12 }
 0x188   : > { %v1560_v63 = vpop.permute.xlu1 %1255  ;;  %v1139_v40 = vpack.c.bf16 %v888_v31, %v1521_v26  ;;  %v1142_v26 = vpack.c.bf16 %v887_v39, %v1519_v25 }
 0x189   : > { %v1257_v38 = vunpack.i.l.bf16 %v1560_v63 }
 0x18c   : > { %v1261_v21 = vpop.permute.xlu1 %1260 }
 0x18d   : > { %v692_v61 = vpop.xlane.xlu0 %691  ;;  %v1263_v32 = vunpack.i.h.bf16 %v1261_v21  ;;  %v1262_v33 = vunpack.i.l.bf16 %v1261_v21 }
 0x18e   : > { %v694_v1 = vmul.f32 0.00390625, %v692_v61 }
 0x190   : > { %v695_v6 = vpack.c.bf16 %v694_v1, %v694_v1 }
 0x191   : > { %v1266_v27 = vpop.permute.xlu0 %1265 }
 0x192   : > { %v707_v13 = vsel %vm505_vm0, %v695_v6, 0  ;;  %v1268_v35 = vunpack.i.h.bf16 %v1266_v27  ;;  %v1267_v36 = vunpack.i.l.bf16 %v1266_v27 }
 0x193   : > { %1165 = vmatpush3.bf16.msra.mxu1 %v707_v13 }
 0x194   : > { %1128 = vmatprep.subr.msk.bf16.mxu1 %vm1126_vm13, %v1127_v12  ;;  %vm914_vm13 = vcmp.lt.s32.totalorder %v1544_v52, 112  ;;  %v928_v42 = vsel %vm927_vm10, %v1267_v36, %v1268_v35  ;;  %v929_v43 = vsel %vm927_vm10, %v1268_v35, %v1267_v36 }
 0x195   : > { %v916_v41 = vsel %vm914_vm13, %v1263_v32, %v1262_v33  ;;  %v915_v45 = vsel %vm914_vm13, %v1262_v33, %v1263_v32  ;;  %v936_v49 = vsel %vm1614_vm11, %v928_v42, 0.0  ;;  %vm955_vm11 = vcmask 588800  }
 0x196   : > { %1167 = vmatmul.mubr.msk.bf16.vlgmr.msra.gmra.mrb[0].mxu1 %vm501_vm1, %v696_v17  ;;  %vm1135_vm1 = vmpackc.low %vm1555_vm7, %vm1624_vm8  ;;  %v946_v53 = vpack.c.bf16 %v936_v49, %v936_v49 }
 0x197   : > { %1131 = vmatpush1.bf16.msk.msra.mxu1 %vm1599_vm15, %v1130_v23  ;;  %997 = vmatprep.mubr.bf16.mxu1 %v1349_v0  ;;  %v1258_v0 = vunpack.i.h.bf16 %v1560_v63  ;;  %vm903_vm15 = vmand %vm821_vm6, %vm1562_vm9 }
 0x198   : > { %1134 = vmatprep.subr.msk.bf16.mxu1 %vm1132_vm3, %v1133_v30  ;;  %vm899_vm3 = vcmp.lt.s32.totalorder %v1544_v52, 113  ;;  %vm931_vm8 = vmand %vm821_vm6, %vm1603_vm4  ;;  %v960_v54 = vsel %vm505_vm0, %v946_v53, 0 }
 0x199   : > { %v901_v44 = vsel %vm899_vm3, %v1258_v0, %v1257_v38  ;;  %vm1144_vm9 = vmpackc.low %vm821_vm6, %vm903_vm15  ;;  %v937_v48 = vsel %vm931_vm8, %v929_v43, 0.0  ;;  %v900_v50 = vsel %vm899_vm3, %v1257_v38, %v1258_v0 }
 0x19a   : > { %v1145_v47 = vpack.c.bf16 %v916_v41, %v901_v44  ;;  %vm1147_vm4 = vmpackc.low %vm1360_vm12, %vm1555_vm7  ;;  %v1148_v25 = vpack.c.bf16 %v915_v45, %v900_v50  ;;  %v947_v51 = vpack.c.bf16 %v937_v48, %v937_v48 }
 0x19b   : > { %1137 = vmatpush1.bf16.msk.msra.mxu1 %vm1135_vm1, %v1136_v37 }
 0x19c   : > { %1140 = vmatprep.subr.msk.bf16.mxu1 %vm1138_vm14, %v1139_v40 }
 0x19d   : > { %v756_v9 = vpop.permute.xlu1 %755 }
 0x19f   : > { %1143 = vmatpush1.bf16.msk.msra.mxu1 %vm1141_vm5, %v1142_v26 }
 0x1a0   : > { %1146 = vmatprep.subr.msk.bf16.mxu1 %vm1144_vm9, %v1145_v47 }
 0x1a1   : > { %v626_v19 = vpop.permute.xlu1 %625 }
 0x1a3   : > { %1149 = vmatpush1.bf16.msk.msra.mxu1 %vm1147_vm4, %v1148_v25 }
 0x1a4   : > { %1150 = vmatprep.subr.msk.bf16.mxu1 %vm505_vm0, %v947_v51  ;;  %vm1786_vm0 = vcmask 15360  }
 0x1a5   : > { %v953_v32 = vpop.permute.xlu1 %952 }
 0x1a7   : > { %974 = vmatpush1.bf16.msra.mxu1 %v960_v54 }
 0x1aa   : > { %1151 = vmatmul.mubr.msk.bf16.vlgmr.msra.gmra.mrb[4].mxu1 %vm955_vm11, %v948_v55 }
 0x1df   : > { %v673_v52 = vpop.f32.mrb[8].mxu0 }
 0x1e0   : > { %v675_v56 = vpop.f32.mrb[9].mxu0  ;;  %v674_v20 = vadd.f32 %v673_v52, %v626_v19 }
 0x1e1   : > { %v677_v57 = vpop.f32.mrb[10].mxu0  ;;  %v676_v21 = vadd.f32 %v675_v56, %v626_v19 }
 0x1e2   : > { %v678_v58 = vpop.f32.mrb[11].mxu0  ;;  %v680_v22 = vsub.f32 0.0, %v674_v20 }
 0x1e3   : > { %v681_v23 = vsub.f32 0.0, %v676_v21 }
 0x1e4   : > { %v682_v24 = vmul.f32 1.442695, %v680_v22 }
 0x1e5   : > { %v684_v27 = vmul.f32 1.442695, %v681_v23 }
 0x269   : > { %v743_v59 = vpop.f32.mrb[0].mxu1 }
 0x26a   : > { %v744_v60 = vadd.f32 %v743_v59, %v1540_v46  ;;  %v1168_v61 = vpop.f32.mrb[1].mxu1 }
 0x26b   : > { %v746_v62 = vpop.f32.mrb[2].mxu1 }
 0x26c   : > { %v749_v63 = vmax.f32 %v744_v60, 0.0  ;;  %v1169_v1 = vpop.f32.mrb[3].mxu1 }
 0x26e   : > { %v751_v2 = vpack.c.bf16 %v749_v63, %v749_v63 }
 0x270   : > { %v762_v3 = vsel %vm632_vm2, %v751_v2, 0 }
 0x271   : > { %1171 = vmatpush3.bf16.msra.mxu0 %v762_v3 }
 0x274   : > { %1173 = vmatmul.mubr.msk.bf16.vlgmr.msra.gmra.mrb[12].mxu0 %vm1786_vm0, %v750_v4 }
 0x27d   : > { %v999_v5 = vpop.f32.mrb[4].mxu1 }
 0x27e   : > { %v1001_v6 = vpop.f32.mrb[5].mxu1  ;;  %v1000_v33 = vadd.f32 %v999_v5, %v953_v32 }
 0x27f   : > { %v1003_v7 = vpop.f32.mrb[6].mxu1  ;;  %v1002_v34 = vadd.f32 %v1001_v6, %v953_v32 }
 0x280   : > { %v1004_v8 = vpop.f32.mrb[7].mxu1  ;;  %v1006_v35 = vmax.f32 %v1000_v33, 0.0 }
 0x281   : > { %v1007_v36 = vmax.f32 %v1002_v34, 0.0 }
 0x347   : > { %v798_v46 = vpop.f32.mrb[12].mxu0 }
 0x348   : > { %v799_v10 = vadd.f32 %v798_v46, %v756_v9  ;;  %v1174_v11 = vpop.f32.mrb[13].mxu0 }
 0x349   : > { %v801_v12 = vpop.f32.mrb[14].mxu0 }
 0x34a   : > { %v804_v13 = vsub.f32 0.0, %v799_v10  ;;  %v1175_v14 = vpop.f32.mrb[15].mxu0 }
 0x34c   : > { %v805_v15 = vmul.f32 1.442695, %v804_v13 }
 0x34e   : > { %1273 = vpow2.f32 %v805_v15 }
 0x358   : > { %v1274_v16 = vpop.eup %1273 }
 0x359   : > { %v807_v17 = vadd.f32 1.0, %v1274_v16 }
 0x35b   : > { %1275 = vrcp.f32 %v807_v17 }
 0x35c   : > { %1277 = vpow2.f32 %v682_v24 }
 0x35d   : > { %1279 = vpow2.f32 %v684_v27 }
 0x365   : > { %v1276_v18 = vpop.eup %1275 }
 0x366   : > { %1010 = vperm.xlu1 %1228, %v1276_v18   ;;  %v1278_v28 = vpop.eup %1277 }
 0x367   : > { %v1280_v29 = vpop.eup %1279  ;;  %v686_v30 = vadd.f32 1.0, %v1278_v28 }
 0x368   : > { %v687_v31 = vadd.f32 1.0, %v1280_v29 }
 0x369   : > { %1281 = vrcp.f32 %v686_v30 }
 0x36a   : > { %1283 = vrcp.f32 %v687_v31 }
 0x373   : > { %v1282_v0 = vpop.eup %1281 }
 0x374   : > { %v1284_v40 = vpop.eup %1283 }
 0x3e5   : > { %v1011_v37 = vpop.permute.xlu1 %1010 }
 0x3e6   : > { %v1013_v38 = vmul.f32 %v1011_v37, %v1006_v35  ;;  %v1014_v39 = vmul.f32 %v1011_v37, %v1007_v36 }
 0x3e8   : > { %v1015_v41 = vmul.f32 %v1282_v0, %v1013_v38  ;;  %v1016_v42 = vmul.f32 %v1284_v40, %v1014_v39 }
 0x3ea   : > { %1017 = vst [vmem:[%s475_s27] sm:$0xff] %v1015_v41  ;;  %1018 = vst [vmem:[%s475_s27 + $0x8] sm:$0xff] %v1016_v42 }
 0x3eb   : > { %1298 = shalt.err (!%p1295_p3)
}
 0x3ec   : > { %s1299_s3 = scalar_lea.hbm %s1702_s21, 256  ;;  %s1303_s27 = scalar_lea.hbm %s1758_s14, 512 }
 0x3ed   : > { %p1300_p4 = scmp.ne.s32.totalorder %s1702_s21, %s1299_s3  ;;  %p1304_p9 = scmp.lt.u32.totalorder %s1702_s21, %s1758_s14 }
 0x3ee   : > { %p1305_p10 = scmp.lt.u32.totalorder %s1303_s27, %s1299_s3  ;;  %p1307_p12 = scmp.lt.u32.totalorder %s1299_s3, %s1702_s21 }
 0x3ef   : > { %p1301_p7 = pnand %p1300_p4, %p1475_p5 }
 0x3f0   : > { %p1306_p11 = por %p1305_p10, %p1304_p9 }
 0x3f1   : > { %p1302_p8 = pneg %p1301_p7 }
 0x3f2   : > { %p1308_p13 = por %p1307_p12, %p1306_p11 }
 0x3f4   : > { %p1309_p0 = pnand %p1308_p13, %p1302_p8 }
 0x3f6   : > { %1312 = shalt.err (!%p1309_p0)
}
 0x3f7   : > { %1176 = dma.vmem_to_hbm [thread:$0]  (%p1475_p5), %s1704_s28, 256, %s1702_s21, %s1020_s17  }
 0x3f8 PF: > { %p1182_p1 = scmp.ge.s32.totalorder %s1347_s16, 2  ;;  %s1046_s26 = sand.u32 1, %s1335_s29  }
 0x3f9   : > { %s1047_s22 = scalar_lea.sflag [#allocation3], %s1046_s26 }
 0x3fa   : > { %p1179_p2 = pnand %p1182_p1, %p1479_p6 }
 0x3fc   : > { %1330 = dma.done.wait (!%p1179_p2), %s1047_s22, 256  }
 0x3fd   : > { %1332 = vsyncadd (!%p1179_p2), %s1047_s22, 4294967040  ;;  %s1788_s16 = sld [smem:[#allocation6_spill]]  ;;  %s1789_s15 = sld [smem:[#allocation5_spill]] }
 0x3fe   : > { %s1790_s3 = sld [smem:[#allocation7_spill]]  ;;  %s1791_s29 = smov %s1339_s30 }
 0x403   : > { %p24_p3 = scmp.ge.s32.totalorder %s1788_s16, 4   ;;  %s1792_s30 = smov %s1789_s15 }
 0x404   : > { %s1793_s15 = smov %s1790_s3 }
 0x405   :  { %26 = sbr.rel (!%p24_p3) target bundleno = 5 (0x5), region = 114 }
 0x40c   :  { %1052 = vsyncpa [#allocation3], 1 }
 0x40d   :  { %1054 = vsyncpa [#allocation3 + $0x1], 1 }

</bundles_post_ra>
